<compile_context>
chip_gen: v6e
topology: v6e:2x2x1
jax: 0.10.0
libtpu: 0.0.40
codegen_flags: <defaults>
</compile_context>

<pallas_src>
import functools

import numpy as np
import jax
import jax.numpy as jnp
from jax import lax
from jax.experimental import pallas as pl
from jax.experimental.pallas import tpu as pltpu

_SUBLANE = 8
_LANE = 128
# Conservative tile budget / scoped-VMEM limit that is valid on v5e (128 MiB
# physical, 16 MiB default scoped), v6e (128 MiB) and v7x (64 MiB physical).
_DEFAULT_TILE_VMEM_BUDGET = 24 * 1024 * 1024
_VMEM_LIMIT_BYTES = 48 * 1024 * 1024


def _round_up(x: int, m: int) -> int:
    return ((x + m - 1) // m) * m


def _cdiv(a: int, b: int) -> int:
    return -(-a // b)


# ---------------------------------------------------------------------------
# Kernels
# ---------------------------------------------------------------------------
def _mb_kernel_fused(feats_ref, mem_ref, scale_ref, out_ref):
    """Single-K-tile path: whole feature dim resident in VMEM.

    No scratch, no init/finalize phases: one MXU dot + epilogue per (i, j).
    """
    feats = feats_ref[...]                                   # (TM, D)
    f32 = feats.astype(jnp.float32)
    # Row squared L2 norm; computed from un-quantized feats so the
    # normalization matches PyTorch even when mem_sum is bf16.
    # (Recomputed per class tile: feats block is VMEM-resident across j, and
    #  recomputing keeps the kernel correct under megacore N-sharding.)
    sumsq = jnp.sum(f32 * f32, axis=1, keepdims=True)        # (TM, 1)
    inv_norm = lax.rsqrt(jnp.maximum(sumsq, 1e-24))          # EUP op
    # MXU "NT" contraction over the lane (dim) axis of both tiles.
    acc = lax.dot_general(
        feats.astype(mem_ref.dtype), mem_ref[...],
        dimension_numbers=(((1,), (1,)), ((), ())),
        preferred_element_type=jnp.float32)                  # (TM, TN) f32
    # scale = 0.5 / ctr folds the class-mean divide and the (+1)/2 rescale.
    out_ref[...] = (acc * inv_norm * scale_ref[...] + 0.5).astype(out_ref.dtype)


def _mb_kernel_ksplit(feats_ref, mem_ref, scale_ref, out_ref, sumsq_ref):
    """K-tiled path (very large dim): accumulate directly into out_ref.

    out_ref's block index (i, j) is constant across k, so the f32 output block
    stays VMEM-resident and doubles as the accumulator (no (TM,TN) scratch).
    """
    k = pl.program_id(2)

    @pl.when(k == 0)
    def _():
        out_ref[...] = jnp.zeros_like(out_ref)
        sumsq_ref[...] = jnp.zeros_like(sumsq_ref)

    feats = feats_ref[...]                                   # (TM, TK)
    f32 = feats.astype(jnp.float32)
    sumsq_ref[...] += jnp.sum(f32 * f32, axis=1, keepdims=True)
    out_ref[...] += lax.dot_general(
        feats.astype(mem_ref.dtype), mem_ref[...],
        dimension_numbers=(((1,), (1,)), ((), ())),
        preferred_element_type=jnp.float32)

    @pl.when(k == pl.num_programs(2) - 1)
    def _():
        inv_norm = lax.rsqrt(jnp.maximum(sumsq_ref[...], 1e-24))
        out_ref[...] = out_ref[...] * inv_norm * scale_ref[...] + 0.5


# ---------------------------------------------------------------------------
# Tile selection & wrapper
# ---------------------------------------------------------------------------
def _select_tiles(bs_a, c_a, dim_a, feats_isz, mem_isz, budget):
    """Pick (TM, TN, TK). Priorities: grid_M == 1 (read mem_sum once),
    K collapsed (no accumulator phases), then split N, then K, then M."""
    tm, tn, tk = bs_a, c_a, dim_a
    # grid_M == 1 means megacore sharding must come from N: give v7x's two
    # TensorCores at least two class tiles when the class axis is big enough.
    if c_a >= 2 * _LANE:
        tn = _round_up(_cdiv(c_a, 2), _LANE)

    def footprint(tm_, tn_, tk_):
        return (2 * tm_ * tk_ * feats_isz        # feats block, double-buffered
                + 2 * tn_ * tk_ * mem_isz        # mem_sum block, double-buffered
                + 2 * tm_ * tn_ * 4              # f32 output block, double-buffered
                + 2 * _SUBLANE * tn_ * 4         # scale row
                + tm_ * _LANE * 4)               # sumsq scratch (K-split only)

    while footprint(tm, tn, tk) > budget:
        if tn > _LANE:                           # split classes first (no re-reads)
            tn = _round_up(_cdiv(tn, 2), _LANE)
        elif tk > _LANE:                         # then split K (adds accumulation)
            tk = _round_up(_cdiv(tk, 2), _LANE)
        elif tm > _SUBLANE:                      # last resort: re-streams mem_sum
            tm = _round_up(_cdiv(tm, 2), _SUBLANE)
        else:
            break
    return tm, tn, tk


def _pad_2d(x, rows, cols, dtype):
    """Zero-pad/cast to (rows, cols); zero-copy when already aligned."""
    if x.shape == (rows, cols) and x.dtype == dtype:
        return x                                  # skip the extra HBM pass
    out = jnp.zeros((rows, cols), dtype)
    return out.at[: x.shape[0], : x.shape[1]].set(x.astype(dtype))


@functools.partial(jax.jit, static_argnames=("mem_dtype", "tile_vmem_budget"))
def memory_bank_forward(feats, mem_sum, ctr, *, mem_dtype=None,
                        tile_vmem_budget=_DEFAULT_TILE_VMEM_BUDGET):
    """scores = (normalize(feats, dim=1) @ (mem_sum / ctr).T + 1) / 2.

    mem_dtype: optional storage dtype for the mem_sum stream only (e.g.
    jnp.bfloat16 to halve the dominant HBM stream on v5e/v6e/v7x); the row
    norm of feats is always taken from the un-quantized values.
    """
    bs, dim = feats.shape
    num_classes = mem_sum.shape[0]

    feats_dt = np.dtype(feats.dtype)
    mem_dt = np.dtype(mem_dtype) if mem_dtype is not None else np.dtype(mem_sum.dtype)

    # Hardware-granular problem sizes, then tiles, then final padded sizes.
    bs_a = _round_up(bs, _SUBLANE)
    c_a = _round_up(num_classes, _LANE)
    dim_a = _round_up(dim, _LANE)
    tm, tn, tk = _select_tiles(bs_a, c_a, dim_a, feats_dt.itemsize,
                               mem_dt.itemsize, tile_vmem_budget)
    bs_p = _round_up(bs, tm)
    c_p = _round_up(num_classes, tn)
    dim_p = _round_up(dim, tk)

    # Padded rows/cols are zero -> contribute 0 to both the dot and sum-of-
    # squares. Copies are skipped entirely when inputs are already aligned.
    feats_p = _pad_2d(feats, bs_p, dim_p, feats_dt)
    mem_p = _pad_2d(mem_sum, c_p, dim_p, mem_dt)
    # Fold (1/ctr) and the (+1)/2 rescale into one tiny row vector (C floats).
    # ctr == 0 gives inf here, matching the PyTorch 0-count behavior; padded
    # classes get scale 0 and are sliced away below.
    scale = jnp.zeros((1, c_p), jnp.float32).at[0, :num_classes].set(
        0.5 / ctr.astype(jnp.float32))

    grid_m, grid_n, grid_k = bs_p // tm, c_p // tn, dim_p // tk

    if grid_k == 1:
        # Fast path: K collapsed -> no scratch, no accumulation phases.
        kernel = _mb_kernel_fused
        grid = (grid_m, grid_n)
        in_specs = [
            pl.BlockSpec((tm, tk), lambda i, j: (i, 0)),   # feats (resident across j)
            pl.BlockSpec((tn, tk), lambda i, j: (j, 0)),   # mem_sum
            pl.BlockSpec((1, tn), lambda i, j: (0, j)),    # scale row
        ]
        out_specs = pl.BlockSpec((tm, tn), lambda i, j: (i, j))
        scratch = []
        dims = ("parallel", "parallel")
    else:
        # Very large feature dim: keep K as the innermost ("arbitrary") axis and
        # accumulate straight into the VMEM-resident output block.
        kernel = _mb_kernel_ksplit
        grid = (grid_m, grid_n, grid_k)
        in_specs = [
            pl.BlockSpec((tm, tk), lambda i, j, k: (i, k)),
            pl.BlockSpec((tn, tk), lambda i, j, k: (j, k)),
            pl.BlockSpec((1, tn), lambda i, j, k: (0, j)),
        ]
        out_specs = pl.BlockSpec((tm, tn), lambda i, j, k: (i, j))
        scratch = [pltpu.VMEM((tm, 1), jnp.float32)]       # row sum-of-squares
        dims = ("parallel", "parallel", "arbitrary")

    out = pl.pallas_call(
        kernel,
        out_shape=jax.ShapeDtypeStruct((bs_p, c_p), jnp.float32),
        grid_spec=pltpu.PrefetchScalarGridSpec(
            num_scalar_prefetch=0,
            grid=grid,
            in_specs=in_specs,
            out_specs=out_specs,
            scratch_shapes=scratch,
        ),
        compiler_params=pltpu.CompilerParams(
            dimension_semantics=dims,
            vmem_limit_bytes=_VMEM_LIMIT_BYTES,
        ),
    )(feats_p, mem_p, scale)

    return out[:bs, :num_classes]


# ---------------------------------------------------------------------------
# Pure-JAX reference (mirrors the PyTorch module)
# ---------------------------------------------------------------------------
def reference_forward(feats, mem_sum, ctr):
    feats = feats.astype(jnp.float32)
    norm = jnp.sqrt(jnp.sum(feats * feats, axis=1, keepdims=True))
    feats_n = feats / jnp.maximum(norm, 1e-12)
    mem = mem_sum.astype(jnp.float32) / ctr.astype(jnp.float32)[:, None]
    sims = feats_n @ mem.T
    return (sims + 1.0) / 2.0


if __name__ == "__main__":
    key = jax.random.PRNGKey(0)
    k_feat, k_mem, k_feat2, k_mem2 = jax.random.split(key, 4)

    # --- 1) Small shapes matching the module (bs=8, dim=32, C=4), f32 ------
    num_classes, dim, bs = 4, 32, 8
    feats = jax.random.normal(k_feat, (bs, dim), dtype=jnp.float32)
    mem_sum = jax.random.normal(k_mem, (num_classes, dim), dtype=jnp.float32) * 3.0
    ctr = jnp.arange(1, num_classes + 1, dtype=jnp.int32) * 2   # [2, 4, 6, 8]

    out = jax.block_until_ready(memory_bank_forward(feats, mem_sum, ctr))
    ref = reference_forward(feats, mem_sum, ctr)
    assert out.shape == (bs, num_classes)
    assert jnp.allclose(out, ref, atol=1e-5, rtol=1e-5), (
        f"f32 mismatch: max abs err {jnp.max(jnp.abs(out - ref))}")

    # --- 2) Larger shapes: fused single-K kernel with >=2 class tiles ------
    bs2, dim2, c2 = 160, 384, 300
    feats2 = jax.random.normal(k_feat2, (bs2, dim2), dtype=jnp.float32)
    mem_sum2 = jax.random.normal(k_mem2, (c2, dim2), dtype=jnp.float32) * 3.0
    ctr2 = (jnp.arange(c2, dtype=jnp.int32) % 7) + 1

    out2 = jax.block_until_ready(memory_bank_forward(feats2, mem_sum2, ctr2))
    ref2 = reference_forward(feats2, mem_sum2, ctr2)
    assert jnp.allclose(out2, ref2, atol=1e-5, rtol=1e-5), (
        f"fused mismatch: max abs err {jnp.max(jnp.abs(out2 - ref2))}")

    # --- 3) Force the K-split / output-accumulation path via a tiny budget -
    out3 = jax.block_until_ready(
        memory_bank_forward(feats2, mem_sum2, ctr2, tile_vmem_budget=256 * 1024))
    assert jnp.allclose(out3, ref2, atol=1e-5, rtol=1e-5), (
        f"k-split mismatch: max abs err {jnp.max(jnp.abs(out3 - ref2))}")

    # --- 4) bf16 mem_sum stream (norm still exact, dot quantized) ----------
    out_bf16 = jax.block_until_ready(
        memory_bank_forward(feats, mem_sum, ctr, mem_dtype=jnp.bfloat16))
    assert jnp.allclose(out_bf16, ref, atol=5e-2, rtol=5e-2), (
        f"bf16 mismatch: max abs err {jnp.max(jnp.abs(out_bf16 - ref))}")

    print("KERNEL_OK")
</pallas_src>

<mosaic_0001>
module attributes {stable_mosaic.version = 11 : i64} {
  func.func @_mb_kernel_fused(%arg0: i32, %arg1: i32, %arg2: memref<8x128xf32, #tpu.memory_space<vmem>>, %arg3: memref<128x128xf32, #tpu.memory_space<vmem>>, %arg4: memref<1x128xf32, #tpu.memory_space<vmem>>, %arg5: memref<8x128xf32, #tpu.memory_space<vmem>>) attributes {dimension_semantics = [#tpu.dimension_semantics<parallel>, #tpu.dimension_semantics<parallel>], iteration_bounds = array<i64: 1, 1>, scalar_prefetch = 0 : i64, scratch_operands = 0 : i64, tpu.core_type = #tpu.core_type<tc>, window_params = [{transform_indices = @transform_0, window_bounds = array<i64: 8, 128>}, {transform_indices = @transform_1, window_bounds = array<i64: 128, 128>}, {transform_indices = @transform_2, window_bounds = array<i64: 1, 128>}, {transform_indices = @transform_3, window_bounds = array<i64: 8, 128>}]} {
    %c0 = arith.constant 0 : index
    %c0_0 = arith.constant 0 : index
    %0 = vector.load %arg2[%c0, %c0_0] : memref<8x128xf32, #tpu.memory_space<vmem>>, vector<8x128xf32>
    %1 = arith.mulf %0, %0 : vector<8x128xf32>
    %cst = arith.constant dense<0.000000e+00> : vector<8xf32>
    %2 = vector.multi_reduction <add>, %1, %cst [1] : vector<8x128xf32> to vector<8xf32>
    %3 = vector.shape_cast %2 : vector<8xf32> to vector<8x1xf32>
    %cst_1 = arith.constant 1.000000e-24 : f32
    %4 = vector.broadcast %cst_1 : f32 to vector<8x1xf32>
    %5 = arith.maximumf %3, %4 : vector<8x1xf32>
    %6 = math.rsqrt %5 : vector<8x1xf32>
    %c0_2 = arith.constant 0 : index
    %c0_3 = arith.constant 0 : index
    %7 = vector.load %arg3[%c0_2, %c0_3] : memref<128x128xf32, #tpu.memory_space<vmem>>, vector<128x128xf32>
    %cst_4 = arith.constant dense<0.000000e+00> : vector<8x128xf32>
    %8 = tpu.matmul %0, %7, %cst_4 {dimension_numbers = #tpu.dot_dimension_numbers<[1], [1], [0], [0], [0, 0, 1, 0], [], []>} : vector<8x128xf32>, vector<128x128xf32>, vector<8x128xf32> -> vector<8x128xf32>
    %9 = vector.broadcast %6 : vector<8x1xf32> to vector<8x128xf32>
    %10 = arith.mulf %8, %9 : vector<8x128xf32>
    %c0_5 = arith.constant 0 : index
    %c0_6 = arith.constant 0 : index
    %11 = vector.load %arg4[%c0_5, %c0_6] : memref<1x128xf32, #tpu.memory_space<vmem>>, vector<1x128xf32>
    %12 = vector.broadcast %11 : vector<1x128xf32> to vector<8x128xf32>
    %13 = arith.mulf %10, %12 : vector<8x128xf32>
    %cst_7 = arith.constant 5.000000e-01 : f32
    %14 = vector.broadcast %cst_7 : f32 to vector<8x128xf32>
    %15 = arith.addf %13, %14 : vector<8x128xf32>
    %c0_8 = arith.constant 0 : index
    %c0_9 = arith.constant 0 : index
    %16 = vector.load %arg5[%c0_8, %c0_9] : memref<8x128xf32, #tpu.memory_space<vmem>>, vector<8x128xf32>
    tpu.vector_store %arg5[%c0_8, %c0_9], %15 {strides = array<i32>} : memref<8x128xf32, #tpu.memory_space<vmem>>, vector<8x128xf32>,
    return
  }
  func.func @transform_0(%arg0: i32, %arg1: i32) -> (i32, i32) {
    %c0_i32 = arith.constant 0 : i32
    %c0_i32_0 = arith.constant 0 : i32
    return %arg0, %c0_i32 : i32, i32
  }
  func.func @transform_1(%arg0: i32, %arg1: i32) -> (i32, i32) {
    %c0_i32 = arith.constant 0 : i32
    %c0_i32_0 = arith.constant 0 : i32
    return %arg1, %c0_i32 : i32, i32
  }
  func.func @transform_2(%arg0: i32, %arg1: i32) -> (i32, i32) {
    %c0_i32 = arith.constant 0 : i32
    %c0_i32_0 = arith.constant 0 : i32
    return %c0_i32, %arg1 : i32, i32
  }
  func.func @transform_3(%arg0: i32, %arg1: i32) -> (i32, i32) {
    %c0_i32 = arith.constant 0 : i32
    return %arg0, %arg1 : i32, i32
  }
}

</mosaic_0001>

<bundles_post_ra>
// kernel: memory_bank_forward.1
= control target key start
LH: loop header
LB: loop body
LE: loop exit
PB: predicated region body
PF: predicated region fallthrough
CT: control target
= control target key end

     0   :  { %v178_v0 = vmov 0.0   ;;  %vm179_vm0 = vmmov 0   ;;  %s257_s1 = inlined_call_operand.vmem [shape: f32[128,128], index: 1, kind: input, shape index: {}]   ;;  %s258_s0 = inlined_call_operand.vmem [shape: f32[8,128], index: 0, kind: input, shape index: {}]   ;;  %s259_s2 = inlined_call_operand.vmem [shape: f32[1,128], index: 2, kind: input, shape index: {}]   ;;  %s260_s3 = inlined_call_operand.vmem [shape: f32[8,128], index: 3, kind: output, shape index: {}]  }
   0x1   :  { %139 = vmatprep.subr.mxu0 %v178_v0  ;;  %v35_v1 = vld [vmem:[%s257_s1 + $0x78] sm:$0xff]  ;;  %171 = vmatprep.mubr.msk.f32.mxu0 %vm179_vm0, %v178_v0  ;;  %v34_v2 = vld [vmem:[%s257_s1 + $0x70] sm:$0xff]  ;;  %v14_v3 = vld [vmem:[%s258_s0] sm:$0xff] }
   0x2   :  { %140 = vmatpush3.xpose.msra.mxu0 %v35_v1  ;;  %v33_v4 = vld [vmem:[%s257_s1 + $0x68] sm:$0xff]  ;;  %v15_v5 = vmul.f32 %v14_v3, %v14_v3  ;;  %v32_v6 = vld [vmem:[%s257_s1 + $0x60] sm:$0xff]  ;;  %v31_v7 = vld [vmem:[%s257_s1 + $0x58] sm:$0xff] }
   0x3   :  { %141 = vmatprep.subr.mxu0 %v178_v0  ;;  %v30_v8 = vld [vmem:[%s257_s1 + $0x50] sm:$0xff]  ;;  %v29_v9 = vld [vmem:[%s257_s1 + $0x48] sm:$0xff]  ;;  %v28_v10 = vld [vmem:[%s257_s1 + $0x40] sm:$0xff] }
   0x4   :  { %16 = vadd.xlane.f32.xlu0 %v15_v5  ;;  %v27_v11 = vld [vmem:[%s257_s1 + $0x38] sm:$0xff]  ;;  %v26_v12 = vld [vmem:[%s257_s1 + $0x30] sm:$0xff]  ;;  %v25_v13 = vld [vmem:[%s257_s1 + $0x28] sm:$0xff] }
   0x5   :  { %v24_v14 = vld [vmem:[%s257_s1 + $0x20] sm:$0xff]  ;;  %v23_v15 = vld [vmem:[%s257_s1 + $0x18] sm:$0xff]  ;;  %v22_v16 = vld [vmem:[%s257_s1 + $0x10] sm:$0xff] }
   0x6   :  { %142 = vmatpush3.xpose.msra.mxu0 %v34_v2  ;;  %v21_v17 = vld [vmem:[%s257_s1 + $0x8] sm:$0xff]  ;;  %v20_v18 = vld [vmem:[%s257_s1] sm:$0xff] }
   0x7   :  { %143 = vmatprep.subr.mxu0 %v178_v0  ;;  %v121_v23 = vld [vmem:[%s259_s2] ss:$0 sm:$0xff] }
   0xa   :  { %144 = vmatpush3.xpose.msra.mxu0 %v33_v4 }
   0xb   :  { %145 = vmatprep.subr.mxu0 %v178_v0 }
   0xe   :  { %146 = vmatpush3.xpose.msra.mxu0 %v32_v6 }
   0xf   :  { %147 = vmatprep.subr.mxu0 %v178_v0 }
  0x12   :  { %148 = vmatpush3.xpose.msra.mxu0 %v31_v7 }
  0x13   :  { %149 = vmatprep.subr.mxu0 %v178_v0 }
  0x16   :  { %150 = vmatpush3.xpose.msra.mxu0 %v30_v8 }
  0x17   :  { %151 = vmatprep.subr.mxu0 %v178_v0 }
  0x1a   :  { %152 = vmatpush3.xpose.msra.mxu0 %v29_v9 }
  0x1b   :  { %153 = vmatprep.subr.mxu0 %v178_v0 }
  0x1e   :  { %154 = vmatpush3.xpose.msra.mxu0 %v28_v10 }
  0x1f   :  { %155 = vmatprep.subr.mxu0 %v178_v0 }
  0x22   :  { %156 = vmatpush3.xpose.msra.mxu0 %v27_v11 }
  0x23   :  { %157 = vmatprep.subr.mxu0 %v178_v0 }
  0x26   :  { %158 = vmatpush3.xpose.msra.mxu0 %v26_v12 }
  0x27   :  { %159 = vmatprep.subr.mxu0 %v178_v0 }
  0x2a   :  { %160 = vmatpush3.xpose.msra.mxu0 %v25_v13 }
  0x2b   :  { %161 = vmatprep.subr.mxu0 %v178_v0 }
  0x2e   :  { %162 = vmatpush3.xpose.msra.mxu0 %v24_v14 }
  0x2f   :  { %163 = vmatprep.subr.mxu0 %v178_v0 }
  0x32   :  { %164 = vmatpush3.xpose.msra.mxu0 %v23_v15 }
  0x33   :  { %165 = vmatprep.subr.mxu0 %v178_v0 }
  0x36   :  { %166 = vmatpush3.xpose.msra.mxu0 %v22_v16 }
  0x37   :  { %167 = vmatprep.subr.mxu0 %v178_v0 }
  0x3a   :  { %168 = vmatpush3.xpose.msra.mxu0 %v21_v17 }
  0x3b   :  { %169 = vmatprep.subr.mxu0 %v178_v0 }
  0x3e   :  { %170 = vmatpush3.xpose.msra.mxu0 %v20_v18 }
  0x41   :  { %172 = vmatmul.mubr.f32.vlgmr.msra.gmra.mxu0 %v14_v3 }
  0x8d   :  { %v17_v19 = vpop.xlane.xlu0 %16 }
  0x8e   :  { %v18_v20 = vmax.f32 %v17_v19, 1e-24 }
  0x90   :  { %176 = vrsqrt.f32 %v18_v20 }
  0x9d   :  { %v177_v21 = vpop.eup %176 }
 0x101   :  { %v102_v22 = vpop.f32.mrf.mxu0 }
 0x102   :  { %v106_v24 = vmul.f32 %v177_v21, %v102_v22 }
 0x103   :  { %v173_v25 = vpop.f32.mrf.mxu0 }
 0x104   :  { %v114_v26 = vmul.f32 %v121_v23, %v106_v24 }
 0x106   :  { %v115_v27 = vadd.f32 0.5, %v114_v26 }
 0x108   :  { %116 = vst [vmem:[%s260_s3] sm:$0xff] %v115_v27 }

</bundles_post_ra>
